<compile_context>
chip_gen: v7x
topology: tpu7x:2x2x1
jax: 0.10.0
libtpu: 0.0.40
codegen_flags: <defaults>
</compile_context>

<pallas_src>
import functools

import numpy as np
import jax
import jax.numpy as jnp
from jax import lax
from jax.experimental import pallas as pl
from jax.experimental.pallas import tpu as pltpu

LANE = 128  # TPU lane width (f32): pad last dims to this for lane-dense vregs/stores
_VMEM_LIMIT = 32 * 1024 * 1024  # generous, safe on v5e/v6e/v7x; data here is < 1 MiB


def _pad2d(a, rows, cols):
    """Zero-pad a 2-D array up to (rows, cols)."""
    r, c = a.shape
    return jnp.pad(a, ((0, rows - r), (0, cols - c)))


# ----------------------------------------------------------------------------
# One-time parameter packing (done OUTSIDE the training step and cached)
# ----------------------------------------------------------------------------
def pack_encoder_params(enc_params):
    """Pack encoder (w1,b1,w2,b2) -> (w_pack [128,256], b_pack [8,128], out_dim)."""
    w1, b1, w2, b2 = enc_params
    w_pack = jnp.concatenate(
        [_pad2d(w1, LANE, LANE), _pad2d(w2, LANE, LANE)], axis=1)
    b_pack = jnp.zeros((8, LANE), jnp.float32)
    b_pack = b_pack.at[0, :b1.shape[1]].set(b1[0])
    b_pack = b_pack.at[1, :b2.shape[1]].set(b2[0])
    return w_pack, b_pack, int(w2.shape[1])


def pack_grace_params(enc_params, proj_params):
    """Pack encoder + projection params -> (w_pack [128,512], b_pack [8,128])."""
    ew1, eb1, ew2, eb2 = enc_params
    fw1, fb1, fw2, fb2 = proj_params
    w_pack = jnp.concatenate(
        [_pad2d(ew1, LANE, LANE), _pad2d(ew2, LANE, LANE),
         _pad2d(fw1, LANE, LANE), _pad2d(fw2, LANE, LANE)], axis=1)
    b_pack = jnp.zeros((8, LANE), jnp.float32)
    for i, b in enumerate((eb1, eb2, fb1, fb2)):
        b_pack = b_pack.at[i, :b.shape[1]].set(b[0])
    return w_pack, b_pack


# ----------------------------------------------------------------------------
# Kernel 1: Model.forward(x, edge_index)  --  x = encoder(x)  (MLP encoder path)
# ----------------------------------------------------------------------------
def _mlp_encoder_kernel(x_ref, w_ref, b_ref, o_ref):
    x = x_ref[...]
    ew1 = w_ref[:, 0 * LANE:1 * LANE]
    ew2 = w_ref[:, 1 * LANE:2 * LANE]
    eb1 = b_ref[0:1, :]
    eb2 = b_ref[1:2, :]
    h = jnp.dot(x, ew1, preferred_element_type=jnp.float32) + eb1
    h = jnp.maximum(h, 0.0)  # ReLU
    y = jnp.dot(h, ew2, preferred_element_type=jnp.float32) + eb2
    o_ref[...] = y.astype(o_ref.dtype)


def model_forward(x, packed_enc):
    """Model.forward(x, edge_index) with args.encoder == 'MLP' (edge_index unused)."""
    w_pack, b_pack, h_out = packed_enc
    n = x.shape[0]
    xp = _pad2d(x, n, LANE)  # lane-dense; zero pads are exact through Linear/ReLU

    vmem = pl.BlockSpec(memory_space=pltpu.MemorySpace.VMEM)
    out = pl.pallas_call(
        _mlp_encoder_kernel,
        out_shape=jax.ShapeDtypeStruct((n, LANE), jnp.float32),  # lane-dense output
        in_specs=[vmem, vmem, vmem],
        out_specs=vmem,
        compiler_params=pltpu.CompilerParams(vmem_limit_bytes=_VMEM_LIMIT),
    )(xp, w_pack, b_pack)
    return out[:, :h_out]


# ----------------------------------------------------------------------------
# Kernel 2: fully fused GRACE pipeline on stacked views
#   z = encoder([x1; x2]); loss = Model.loss(z1, z2, mean=True)
#   (projection -> F.normalize -> exp(sim/tau) -> InfoNCE, args.loss == 'info')
# ----------------------------------------------------------------------------
def _grace_fused_kernel(x_ref, w_ref, b_ref, o_ref, *, n, tau):
    inv_tau = 1.0 / tau
    m2 = 2 * n

    # Static, lane-aligned slices of the packed parameter slabs (no relayout).
    ew1 = w_ref[:, 0 * LANE:1 * LANE]
    ew2 = w_ref[:, 1 * LANE:2 * LANE]
    fw1 = w_ref[:, 2 * LANE:3 * LANE]
    fw2 = w_ref[:, 3 * LANE:4 * LANE]
    eb1 = b_ref[0:1, :]
    eb2 = b_ref[1:2, :]
    fb1 = b_ref[2:3, :]
    fb2 = b_ref[3:4, :]

    x = x_ref[...]  # [2N, 128] -- both views stacked, matmuls run at M = 2N

    # Encoder: Linear -> ReLU -> Linear
    h = jnp.dot(x, ew1, preferred_element_type=jnp.float32) + eb1
    h = jnp.maximum(h, 0.0)
    z = jnp.dot(h, ew2, preferred_element_type=jnp.float32) + eb2

    # Projection head: ELU(fc1) -> fc2
    a = jnp.dot(z, fw1, preferred_element_type=jnp.float32) + fb1
    a = jnp.where(a > 0, a, jnp.expm1(jnp.minimum(a, 0.0)))  # ELU(alpha=1)
    p = jnp.dot(a, fw2, preferred_element_type=jnp.float32) + fb2

    # F.normalize (eps=1e-12): rsqrt on the EUP slot (sqrt(1e-24) == 1e-12)
    ss = jnp.sum(p * p, axis=-1, keepdims=True)
    n_all = p * lax.rsqrt(jnp.maximum(ss, 1e-24))  # [2N, 128]

    # Single Gram matmul: G = n_all @ n_all^T (contract last dims, no transpose).
    dn = (((1,), (1,)), ((), ()))
    g = lax.dot_general(n_all, n_all, dn, preferred_element_type=jnp.float32)  # [2N,2N]

    # exp((sim - 1)/tau): shift by the known row max (self-sim of unit rows == 1)
    # so the exponent is always <= 0 -> no overflow even for tiny tau.
    e = jnp.exp(g * inv_tau - inv_tau)

    # denom_r = refl_sum + between_sum - refl_diag == off-diagonal row sum of e.
    # Subtract the ACTUAL shifted diagonal (mask it out) rather than assuming 1.0,
    # so fp error in ||n||^2 and degenerate zero rows are handled exactly.
    rr = lax.broadcasted_iota(jnp.int32, (m2, m2), 0)
    cc = lax.broadcasted_iota(jnp.int32, (m2, m2), 1)
    denom = jnp.sum(jnp.where(rr == cc, 0.0, e), axis=1, keepdims=True)  # [2N, 1]

    # Positive logit: diag(n1 @ n2^T) as a row-wise dot (identical for both
    # directions, so its mean over 2N rows equals its mean over these N values).
    pos = jnp.sum(n_all[:n, :] * n_all[n:, :], axis=-1, keepdims=True)   # [N, 1]

    # loss_r = log(denom_r) + 1/tau - pos_r/tau ; final scalar = mean over 2N rows
    loss = jnp.mean(jnp.log(denom)) + inv_tau - inv_tau * jnp.mean(pos)
    # Note: (1,1) VMEM scalar output kept (known-good lowering); SMEM scalar output
    # would save only one masked store at these sizes.
    o_ref[0, 0] = loss


def model_grace_loss(x1, x2, packed_params, tau=0.5):
    """Fused: encoder on both views + Model.loss(z1, z2, mean=True), args.loss=='info'."""
    w_pack, b_pack = packed_params
    n = x1.shape[0]
    # Stack the two views into one lane-dense operand (zero pads are exact).
    x_all = jnp.concatenate([_pad2d(x1, n, LANE), _pad2d(x2, n, LANE)], axis=0)

    vmem = pl.BlockSpec(memory_space=pltpu.MemorySpace.VMEM)
    out = pl.pallas_call(
        functools.partial(_grace_fused_kernel, n=n, tau=float(tau)),
        out_shape=jax.ShapeDtypeStruct((1, 1), jnp.float32),
        in_specs=[vmem, vmem, vmem],
        out_specs=vmem,
        compiler_params=pltpu.CompilerParams(vmem_limit_bytes=_VMEM_LIMIT),
    )(x_all, w_pack, b_pack)
    return out[0, 0]


# ----------------------------------------------------------------------------
# Parameter init (PyTorch nn.Linear default: U(-1/sqrt(fan_in), 1/sqrt(fan_in)))
# ----------------------------------------------------------------------------
def _linear_params(key, fan_in, fan_out):
    kw, kb = jax.random.split(key)
    bound = 1.0 / np.sqrt(fan_in)
    w = jax.random.uniform(kw, (fan_in, fan_out), jnp.float32, -bound, bound)
    b = jax.random.uniform(kb, (1, fan_out), jnp.float32, -bound, bound)
    return w, b


# ----------------------------------------------------------------------------
# Pure-JAX references (PyTorch-faithful formulation) for correctness checks
# ----------------------------------------------------------------------------
def _ref_forward(x, enc_params):
    w1, b1, w2, b2 = enc_params
    h = jnp.maximum(x @ w1 + b1, 0.0)
    return h @ w2 + b2


def _ref_grace_loss(x1, x2, enc_params, proj_params, tau):
    z1 = _ref_forward(x1, enc_params)
    z2 = _ref_forward(x2, enc_params)
    wf1, bf1, wf2, bf2 = proj_params

    def proj(z):
        a = z @ wf1 + bf1
        a = jnp.where(a > 0, a, jnp.expm1(jnp.minimum(a, 0.0)))
        return a @ wf2 + bf2

    def norm(h):
        return h / jnp.maximum(jnp.linalg.norm(h, axis=-1, keepdims=True), 1e-12)

    def semi(a, b):
        refl = jnp.exp((a @ a.T) / tau)
        betw = jnp.exp((a @ b.T) / tau)
        return -jnp.log(jnp.diag(betw) /
                        (refl.sum(1) + betw.sum(1) - jnp.diag(refl)))

    n1, n2 = norm(proj(z1)), norm(proj(z2))
    return jnp.mean((semi(n1, n2) + semi(n2, n1)) * 0.5)


# ----------------------------------------------------------------------------
if __name__ == "__main__":
    # Small shapes: nnodes=16, in_feats=32, num_hidden=32, num_proj_hidden=64
    N, F, H, P = 16, 32, 32, 64
    NUM_CLASSES = 4  # class_head exists in __init__ but is unused by forward()
    TAU = 0.5

    key = jax.random.PRNGKey(0)
    k_x, k_x2, k_e1, k_e2, k_f1, k_f2, k_ch = jax.random.split(key, 7)

    # inputs (two augmented views of the node features)
    x = jax.random.normal(k_x, (N, F), jnp.float32)
    x2 = x + 0.05 * jax.random.normal(k_x2, (N, F), jnp.float32)
    # edge_index (unused on the MLP-encoder / 'info'-loss paths, kept for signature parity)
    edge_index = jnp.stack([jnp.arange(N, dtype=jnp.int32),
                            jnp.roll(jnp.arange(N, dtype=jnp.int32), 1)])

    # encoder (2-layer MLP): Linear(F,H) -> ReLU -> Linear(H,H)
    ew1, eb1 = _linear_params(k_e1, F, H)
    ew2, eb2 = _linear_params(k_e2, H, H)
    enc_params = (ew1, eb1, ew2, eb2)

    # projection head: fc1 Linear(H,P), fc2 Linear(P,H)
    fw1, fb1 = _linear_params(k_f1, H, P)
    fw2, fb2 = _linear_params(k_f2, P, H)
    proj_params = (fw1, fb1, fw2, fb2)

    # class_head Linear(H, NUM_CLASSES) — defined for parity, not used by forward()
    _cw, _cb = _linear_params(k_ch, H, NUM_CLASSES)
    # TODO(synk): finetune()'s class_head + log_softmax and the GNN-encoder /
    # 'uniform'/'align'/'info-neighbor' loss branches are not part of forward()
    # with args.encoder=='MLP', args.loss=='info'; omitted from the kernels.

    # One-time parameter packing (amortized across training steps).
    packed_enc = pack_encoder_params(enc_params)
    packed_grace = pack_grace_params(enc_params, proj_params)

    # ---- forward pass (Pallas kernel, packed params, lane-dense) ----
    z1 = model_forward(x, packed_enc)
    jax.block_until_ready(z1)
    z1_ref = _ref_forward(x, enc_params)
    assert np.allclose(np.asarray(z1), np.asarray(z1_ref), rtol=1e-4, atol=1e-5)

    # ---- fused GRACE contrastive loss on two stacked views (single Pallas kernel) ----
    loss_val = model_grace_loss(x, x2, packed_grace, tau=TAU)
    jax.block_until_ready(loss_val)
    loss_ref = _ref_grace_loss(x, x2, enc_params, proj_params, TAU)
    assert np.allclose(float(loss_val), float(loss_ref), rtol=1e-4, atol=1e-5)

    print("KERNEL_OK")
</pallas_src>

<mosaic_0001>
module attributes {stable_mosaic.version = 11 : i64} {
  func.func @_mlp_encoder_kernel(%arg0: memref<16x128xf32, #tpu.memory_space<vmem>>, %arg1: memref<128x256xf32, #tpu.memory_space<vmem>>, %arg2: memref<8x128xf32, #tpu.memory_space<vmem>>, %arg3: memref<16x128xf32, #tpu.memory_space<vmem>>) attributes {dimension_semantics = [], scalar_prefetch = 0 : i64, scratch_operands = 0 : i64, tpu.core_type = #tpu.core_type<tc>} {
    %c0 = arith.constant 0 : index
    %c0_0 = arith.constant 0 : index
    %0 = vector.load %arg0[%c0, %c0_0] : memref<16x128xf32, #tpu.memory_space<vmem>>, vector<16x128xf32>
    %c0_1 = arith.constant 0 : index
    %c0_2 = arith.constant 0 : index
    %1 = vector.load %arg1[%c0_1, %c0_2] : memref<128x256xf32, #tpu.memory_space<vmem>>, vector<128x128xf32>
    %c0_3 = arith.constant 0 : index
    %c128 = arith.constant 128 : index
    %2 = vector.load %arg1[%c0_3, %c128] : memref<128x256xf32, #tpu.memory_space<vmem>>, vector<128x128xf32>
    %c0_4 = arith.constant 0 : index
    %c0_5 = arith.constant 0 : index
    %3 = vector.load %arg2[%c0_4, %c0_5] : memref<8x128xf32, #tpu.memory_space<vmem>>, vector<1x128xf32>
    %c1 = arith.constant 1 : index
    %c0_6 = arith.constant 0 : index
    %4 = vector.load %arg2[%c1, %c0_6] : memref<8x128xf32, #tpu.memory_space<vmem>>, vector<1x128xf32>
    %cst = arith.constant dense<0.000000e+00> : vector<16x128xf32>
    %5 = tpu.matmul %0, %1, %cst {dimension_numbers = #tpu.dot_dimension_numbers<[1], [0], [0], [1], [0, 0, 1, 1], [], []>} : vector<16x128xf32>, vector<128x128xf32>, vector<16x128xf32> -> vector<16x128xf32>
    %6 = vector.broadcast %3 : vector<1x128xf32> to vector<16x128xf32>
    %7 = arith.addf %5, %6 : vector<16x128xf32>
    %cst_7 = arith.constant 0.000000e+00 : f32
    %8 = vector.broadcast %cst_7 : f32 to vector<16x128xf32>
    %9 = arith.maximumf %7, %8 : vector<16x128xf32>
    %cst_8 = arith.constant dense<0.000000e+00> : vector<16x128xf32>
    %10 = tpu.matmul %9, %2, %cst_8 {dimension_numbers = #tpu.dot_dimension_numbers<[1], [0], [0], [1], [0, 0, 1, 1], [], []>} : vector<16x128xf32>, vector<128x128xf32>, vector<16x128xf32> -> vector<16x128xf32>
    %11 = vector.broadcast %4 : vector<1x128xf32> to vector<16x128xf32>
    %12 = arith.addf %10, %11 : vector<16x128xf32>
    %c0_9 = arith.constant 0 : index
    %c0_10 = arith.constant 0 : index
    %13 = vector.load %arg3[%c0_9, %c0_10] : memref<16x128xf32, #tpu.memory_space<vmem>>, vector<16x128xf32>
    tpu.vector_store %arg3[%c0_9, %c0_10], %12 {strides = array<i32>} : memref<16x128xf32, #tpu.memory_space<vmem>>, vector<16x128xf32>,
    return
  }
}

</mosaic_0001>

<bundles_post_ra>
// kernel: tpu_custom_call.1
= control target key start
LH: loop header
LB: loop body
LE: loop exit
PB: predicated region body
PF: predicated region fallthrough
CT: control target
= control target key end

     0   :  { %8 = vsyncpa [#allocation3], 0  ;;  %s626_s0 = inlined_call_operand.hbm [shape: f32[16,128], index: 0, kind: input, shape index: {}]   ;;  %s627_s1 = inlined_call_operand.hbm [shape: f32[128,256], index: 1, kind: input, shape index: {}]   ;;  %s628_s2 = inlined_call_operand.hbm [shape: f32[8,128], index: 2, kind: input, shape index: {}]   ;;  %s629_s3 = inlined_call_operand.hbm [shape: f32[16,128], index: 3, kind: output, shape index: {}]  }
   0x1   :  { %9 = vsyncpa [#allocation6], 0 }
   0x2   :  { %10 = vsyncpa [#allocation4], 0  ;;  %s544_s12 = smov [#allocation5]   ;;  %s450_s16 = scalar_lea.hbm %s627_s1, 4096 }
   0x3   :  { %s28_s13 = sshll.u32 %s544_s12, 4  ;;  %p451_p0 = scmp.ne.s32.totalorder %s627_s1, %s450_s16  ;;  %s29_s13 = int_to_ptr.vmem [resolvable:$true] %s28_s13 }
   0x4   :  { %p454_p1 = scmp.lt.u32.totalorder %s450_s16, %s627_s1 }
   0x6   :  { %p456_p2 = pnand %p454_p1, %p451_p0 }
   0x8   :  { %459 = shalt.err (!%p456_p2)
}
   0x9   :  { %s460_s21 = scalar_lea.vmem %s29_s13, 4096  ;;  %p465_p4 = scmp.lt.s32.totalorder %s29_s13, %s29_s13 }
   0xa   :  { %p461_p3 = scmp.ne.s32.totalorder %s29_s13, %s460_s21  ;;  %p466_p5 = scmp.lt.s32.totalorder %s460_s21, %s460_s21 }
   0xc   :  { %p467_p6 = por %p466_p5, %p465_p4 }
   0xe   :  { %p468_p7 = pnand %p467_p6, %p461_p3 }
  0x10   :  { %471 = shalt.err (!%p468_p7)
}
  0x11   :  { %s545_s22 = smov 256   ;;  %s546_s23 = smov 16  }
  0x12   :  { %34 = dma.hbm_to_vmem [thread:$0]  %s627_s1, 4096, %s29_s13, [#allocation6], %s545_s22, %s545_s22, %s546_s23  }
  0x13   :  { %s547_s26 = smov [#allocation2]   ;;  %s472_s30 = scalar_lea.hbm %s626_s0, 256 }
  0x14   :  { %s16_s27 = sshll.u32 %s547_s26, 4  ;;  %p473_p8 = scmp.ne.s32.totalorder %s626_s0, %s472_s30  ;;  %s17_s27 = int_to_ptr.vmem [resolvable:$true] %s16_s27 }
  0x15   :  { %p476_p9 = scmp.lt.u32.totalorder %s472_s30, %s626_s0 }
  0x17   :  { %p478_p10 = pnand %p476_p9, %p473_p8 }
  0x19   :  { %481 = shalt.err (!%p478_p10)
}
  0x1a   :  { %s482_s8 = scalar_lea.vmem %s17_s27, 256  ;;  %p487_p12 = scmp.lt.s32.totalorder %s17_s27, %s17_s27 }
  0x1b   :  { %p483_p11 = scmp.ne.s32.totalorder %s17_s27, %s482_s8  ;;  %p488_p13 = scmp.lt.s32.totalorder %s482_s8, %s482_s8 }
  0x1d   :  { %p489_p0 = por %p488_p13, %p487_p12 }
  0x1f   :  { %p490_p1 = pnand %p489_p0, %p483_p11 }
  0x21   :  { %493 = shalt.err (!%p490_p1)
}
  0x22   :  { %s548_s1 = smov 128   ;;  %s549_s9 = smov 8  }
  0x23   :  { %22 = dma.hbm_to_vmem [thread:$0]  %s626_s0, 256, %s17_s27, [#allocation3], %s548_s1, %s548_s1, %s549_s9  }
  0x24   :  { %s550_s12 = smov [#allocation7]   ;;  %s494_s16 = scalar_lea.hbm %s628_s2, 128 }
  0x25   :  { %s41_s13 = sshll.u32 %s550_s12, 4  ;;  %p495_p2 = scmp.ne.s32.totalorder %s628_s2, %s494_s16  ;;  %s42_s13 = int_to_ptr.vmem [resolvable:$true] %s41_s13 }
  0x26   :  { %p498_p3 = scmp.lt.u32.totalorder %s494_s16, %s628_s2 }
  0x28   :  { %p500_p4 = pnand %p498_p3, %p495_p2 }
  0x2a   :  { %503 = shalt.err (!%p500_p4)
}
  0x2b   :  { %s504_s21 = scalar_lea.vmem %s42_s13, 128  ;;  %p509_p6 = scmp.lt.s32.totalorder %s42_s13, %s42_s13 }
  0x2c   :  { %p505_p5 = scmp.ne.s32.totalorder %s42_s13, %s504_s21  ;;  %p510_p7 = scmp.lt.s32.totalorder %s504_s21, %s504_s21 }
  0x2e   :  { %p511_p8 = por %p510_p7, %p509_p6 }
  0x30   :  { %p512_p9 = pnand %p511_p8, %p505_p5 }
  0x32   :  { %515 = shalt.err (!%p512_p9)
}
  0x33   :  { %44 = dma.hbm_to_vmem [thread:$0]  %s628_s2, 128, %s42_s13, [#allocation6]  }
  0x34   :  { %538 = dma.done.wait [#allocation3], 256  }
  0x35   :  { %539 = vsyncadd [#allocation3], 4294967040 }
  0x36   :  { %540 = dma.done.wait [#allocation6], 4224  }
  0x37   :  { %541 = vsyncadd [#allocation6], 4294963072  ;;  %v56_v0 = vld [vmem:[#allocation5] sm:$0xff]  ;;  %v57_v1 = vld [vmem:[#allocation5 + $0x10] sm:$0xff]  ;;  %s551_s2 = smov [#allocation8]  }
  0x38   :  { %v58_v2 = vld [vmem:[#allocation5 + $0x20] sm:$0xff]  ;;  %v378_v3 = vpack.c.bf16 %v57_v1, %v56_v0  ;;  %v59_v4 = vld [vmem:[#allocation5 + $0x30] sm:$0xff]  ;;  %v72_v12 = vld [vmem:[#allocation5 + $0x8] sm:$0xff]  ;;  %s257_s23 = sshll.u32 %s551_s2, 4  ;;  %s258_s23 = int_to_ptr.vmem [resolvable:$true] %s257_s23 }
  0x39   :  { %v382_v5 = vpack.c.bf16 %v59_v4, %v58_v2  ;;  %v60_v6 = vld [vmem:[#allocation5 + $0x40] sm:$0xff]  ;;  %v61_v7 = vld [vmem:[#allocation5 + $0x50] sm:$0xff]  ;;  %v73_v13 = vld [vmem:[#allocation5 + $0x18] sm:$0xff]  ;;  %s516_s24 = scalar_lea.vmem %s258_s23, 256  ;;  %p521_p11 = scmp.lt.s32.totalorder %s258_s23, %s258_s23 }
  0x3a   :  { %379 = vmatprep.subr.bf16.mxu0 %v378_v3  ;;  %v386_v8 = vpack.c.bf16 %v61_v7, %v60_v6  ;;  %v62_v9 = vld [vmem:[#allocation5 + $0x60] sm:$0xff]  ;;  %v63_v10 = vld [vmem:[#allocation5 + $0x70] sm:$0xff]  ;;  %v74_v14 = vld [vmem:[#allocation5 + $0x28] sm:$0xff]  ;;  %v410_v15 = vpack.c.bf16 %v73_v13, %v72_v12  ;;  %p517_p10 = scmp.ne.s32.totalorder %s258_s23, %s516_s24  ;;  %p522_p12 = scmp.lt.s32.totalorder %s516_s24, %s516_s24 }
  0x3b   :  { %381 = vmatpush3.bf16.msra.mxu0 %v378_v3  ;;  %v54_v11 = vld [vmem:[#allocation2] sm:$0xff]  ;;  %v75_v16 = vld [vmem:[#allocation5 + $0x38] sm:$0xff]  ;;  %v76_v18 = vld [vmem:[#allocation5 + $0x48] sm:$0xff]  ;;  %v390_v20 = vpack.c.bf16 %v63_v10, %v62_v9 }
  0x3c   :  { %383 = vmatprep.subr.bf16.mxu0 %v382_v5  ;;  %340 = vmatprep.mubr.f32.mxu0 %v54_v11  ;;  %v414_v17 = vpack.c.bf16 %v75_v16, %v74_v14  ;;  %v77_v19 = vld [vmem:[#allocation5 + $0x58] sm:$0xff]  ;;  %v64_v21 = vld [vmem:[#allocation5 + $0x80] sm:$0xff]  ;;  %v65_v22 = vld [vmem:[#allocation5 + $0x90] sm:$0xff]  ;;  %p523_p13 = por %p522_p12, %p521_p11 }
  0x3d   :  { %411 = vmatprep.subr.bf16.mxu1 %v410_v15  ;;  %v418_v23 = vpack.c.bf16 %v77_v19, %v76_v18  ;;  %v78_v24 = vld [vmem:[#allocation5 + $0x68] sm:$0xff]  ;;  %v79_v25 = vld [vmem:[#allocation5 + $0x78] sm:$0xff]  ;;  %v394_v26 = vpack.c.bf16 %v65_v22, %v64_v21  ;;  %v66_v27 = vld [vmem:[#allocation5 + $0xa0] sm:$0xff] }
  0x3e   :  { %413 = vmatpush3.bf16.msra.mxu1 %v410_v15  ;;  %v67_v28 = vld [vmem:[#allocation5 + $0xb0] sm:$0xff]  ;;  %v422_v29 = vpack.c.bf16 %v79_v25, %v78_v24  ;;  %v80_v30 = vld [vmem:[#allocation5 + $0x88] sm:$0xff]  ;;  %v81_v31 = vld [vmem:[#allocation5 + $0x98] sm:$0xff]  ;;  %p524_p0 = pnand %p523_p13, %p517_p10 }
  0x3f   :  { %385 = vmatpush3.bf16.msra.mxu0 %v382_v5  ;;  %415 = vmatprep.subr.bf16.mxu1 %v414_v17  ;;  %v398_v32 = vpack.c.bf16 %v67_v28, %v66_v27  ;;  %v68_v33 = vld [vmem:[#allocation5 + $0xc0] sm:$0xff]  ;;  %v69_v34 = vld [vmem:[#allocation5 + $0xd0] sm:$0xff]  ;;  %v426_v35 = vpack.c.bf16 %v81_v31, %v80_v30  ;;  %v82_v36 = vld [vmem:[#allocation5 + $0xa8] sm:$0xff] }
  0x40   :  { %387 = vmatprep.subr.bf16.mxu0 %v386_v8  ;;  %v83_v37 = vld [vmem:[#allocation5 + $0xb8] sm:$0xff]  ;;  %v402_v38 = vpack.c.bf16 %v69_v34, %v68_v33  ;;  %v70_v39 = vld [vmem:[#allocation5 + $0xe0] sm:$0xff]  ;;  %v71_v40 = vld [vmem:[#allocation5 + $0xf0] sm:$0xff] }
  0x41   :  { %v430_v41 = vpack.c.bf16 %v83_v37, %v82_v36  ;;  %v84_v42 = vld [vmem:[#allocation5 + $0xc8] sm:$0xff]  ;;  %v85_v43 = vld [vmem:[#allocation5 + $0xd8] sm:$0xff]  ;;  %v406_v44 = vpack.c.bf16 %v71_v40, %v70_v39  ;;  %v270_v50 = vld [vmem:[#allocation7] ss:$0 sm:$0xff] }
  0x42   :  { %417 = vmatpush3.bf16.msra.mxu1 %v414_v17  ;;  %v434_v45 = vpack.c.bf16 %v85_v43, %v84_v42  ;;  %v55_v46 = vld [vmem:[#allocation2 + $0x8] sm:$0xff]  ;;  %v86_v47 = vld [vmem:[#allocation5 + $0xe8] sm:$0xff]  ;;  %v271_v57 = vld [vmem:[#allocation7 + $0x1] ss:$0 sm:$0xff] }
  0x43   :  { %389 = vmatpush3.bf16.msra.mxu0 %v386_v8  ;;  %419 = vmatprep.subr.bf16.mxu1 %v418_v23  ;;  %v87_v48 = vld [vmem:[#allocation5 + $0xf8] sm:$0xff] }
  0x44   :  { %391 = vmatprep.subr.bf16.mxu0 %v390_v20  ;;  %v438_v49 = vpack.c.bf16 %v87_v48, %v86_v47 }
  0x46   :  { %421 = vmatpush3.bf16.msra.mxu1 %v418_v23 }
  0x47   :  { %393 = vmatpush3.bf16.msra.mxu0 %v390_v20  ;;  %423 = vmatprep.subr.bf16.mxu1 %v422_v29 }
  0x48   :  { %395 = vmatprep.subr.bf16.mxu0 %v394_v26 }
  0x4a   :  { %425 = vmatpush3.bf16.msra.mxu1 %v422_v29 }
  0x4b   :  { %397 = vmatpush3.bf16.msra.mxu0 %v394_v26  ;;  %427 = vmatprep.subr.bf16.mxu1 %v426_v35 }
  0x4c   :  { %399 = vmatprep.subr.bf16.mxu0 %v398_v32 }
  0x4e   :  { %429 = vmatpush3.bf16.msra.mxu1 %v426_v35 }
  0x4f   :  { %401 = vmatpush3.bf16.msra.mxu0 %v398_v32  ;;  %431 = vmatprep.subr.bf16.mxu1 %v430_v41 }
  0x50   :  { %403 = vmatprep.subr.bf16.mxu0 %v402_v38 }
  0x52   :  { %433 = vmatpush3.bf16.msra.mxu1 %v430_v41 }
  0x53   :  { %405 = vmatpush3.bf16.msra.mxu0 %v402_v38  ;;  %435 = vmatprep.subr.bf16.mxu1 %v434_v45 }
  0x54   :  { %407 = vmatprep.subr.bf16.mxu0 %v406_v44 }
  0x56   :  { %437 = vmatpush3.bf16.msra.mxu1 %v434_v45 }
  0x57   :  { %409 = vmatpush3.bf16.msra.mxu0 %v406_v44  ;;  %439 = vmatprep.subr.bf16.mxu1 %v438_v49 }
  0x5a   :  { %341 = vmatmul.mubr.f32.vlgmr.msra.gmra.mrb[0].mxu0 %v55_v46  ;;  %441 = vmatpush3.bf16.msra.mxu1 %v438_v49 }
 0x12d   :  { %v342_v51 = vpop.f32.mrb[0].mxu0 }
 0x12e   :  { %v166_v52 = vadd.f32 %v342_v51, %v270_v50  ;;  %v160_v53 = vpop.f32.mrb[1].mxu0 }
 0x12f   :  { %v161_v54 = vadd.f32 %v270_v50, %v160_v53 }
 0x130   :  { %v170_v56 = vmax.f32 %v166_v52, 0.0 }
 0x131   :  { %v169_v55 = vmax.f32 %v161_v54, 0.0 }
 0x133   :  { %375 = vmatprep.mubr.f32.mxu1 %v169_v55 }
 0x134   :  { %376 = vmatmul.mubr.f32.vlgmr.msra.gmra.mrb[0].mxu1 %v170_v56 }
 0x207   :  { %v377_v58 = vpop.f32.mrb[0].mxu1 }
 0x208   :  { %v247_v59 = vadd.f32 %v377_v58, %v271_v57  ;;  %v241_v60 = vpop.f32.mrb[1].mxu1 }
 0x209   :  { %v242_v61 = vadd.f32 %v271_v57, %v241_v60 }
 0x20a   :  { %251 = vst [vmem:[#allocation8 + $0x8] sm:$0xff] %v247_v59 }
 0x20b   :  { %250 = vst [vmem:[#allocation8] sm:$0xff] %v242_v61 }
 0x20c   :  { %527 = shalt.err (!%p524_p0)
}
 0x20d   :  { %s528_s27 = scalar_lea.hbm %s629_s3, 256 }
 0x20e   :  { %p529_p1 = scmp.ne.s32.totalorder %s629_s3, %s528_s27  ;;  %p532_p2 = scmp.lt.u32.totalorder %s528_s27, %s629_s3 }
 0x210   :  { %p534_p3 = pnand %p532_p2, %p529_p1 }
 0x212   :  { %537 = shalt.err (!%p534_p3)
}
 0x213   :  { %263 = dma.vmem_to_hbm [thread:$0]  %s258_s23, 256, %s629_s3, [#allocation4], %s548_s1, %s548_s1, %s549_s9  }
 0x214   :  { %542 = dma.done.wait [#allocation4], 256  }
 0x215   :  { %543 = vsyncadd [#allocation4], 4294967040 }
 0x216   :  { %267 = vsyncpa [#allocation3], 1 }
 0x217   :  { %268 = vsyncpa [#allocation6], 1 }
 0x218   :  { %269 = vsyncpa [#allocation4], 1 }

</bundles_post_ra>
